<compile_context>
chip_gen: v5e
topology: v5e:2x2
jax: 0.10.0
libtpu: 0.0.40
codegen_flags: <defaults>
</compile_context>

<pallas_src>
import jax
import jax.numpy as jnp
from jax.experimental import pallas as pl
from jax.experimental.pallas import tpu as pltpu

IN_FEATURES = 10
OUT_FEATURES = 1
GROUP = 128                        # batch rows folded onto the lane axis
DENSE_COLS = GROUP * IN_FEATURES   # 1280 lanes per dense row
MAX_TILE_G = 1024                  # groups per grid step -> 128K rows, 5 MiB x-tile


def _round_up(n: int, m: int) -> int:
    return (n + m - 1) // m * m


def linear_kernel(x_ref, w_ref, b_ref, o_ref):
    # x_ref: (tile_g, 1280) VMEM -- 128 batch rows packed lane-dense per row
    # w_ref: (1280, 128)    VMEM -- block-diagonal weight, resident across grid
    # b_ref: (1, 1)         SMEM -- scalar bias
    # o_ref: (tile_g, 128)  VMEM -- lane-dense output (one scalar per batch row)
    acc = jnp.dot(x_ref[...], w_ref[...], preferred_element_type=jnp.float32)
    o_ref[...] = (acc + b_ref[0, 0].astype(jnp.float32)).astype(o_ref.dtype)


def linear_pallas(x, w, b):
    """y = x @ w.T + b  with x: (..., 10), w: (1, 10), b: (1,)."""
    lead_shape = x.shape[:-1]
    x2d = x.reshape(-1, IN_FEATURES)
    B = x2d.shape[0]

    # Minimal pad: only up to a multiple of GROUP (128) rows so the row-major
    # reshape (Bp, 10) -> (Bp/128, 1280) is a pure re-view of contiguous data.
    Bp = _round_up(max(B, GROUP), GROUP)
    if Bp != B:
        x2d = jnp.pad(x2d, ((0, Bp - B), (0, 0)))
    g_total = Bp // GROUP
    x_dense = x2d.reshape(g_total, DENSE_COLS)

    # Block-diagonal weight (1280, 128): column j carries w in rows 10j..10j+9,
    # so (x_dense @ w_blk)[g, j] == (x @ w.T)[128*g + j, 0].
    w_col = w.reshape(IN_FEATURES, OUT_FEATURES).astype(jnp.float32)    # (10, 1)
    w_blk = jnp.kron(jnp.eye(GROUP, dtype=jnp.float32), w_col)          # (1280, 128)
    b_sc = b.reshape(1, 1).astype(jnp.float32)

    tile_g = min(MAX_TILE_G, g_total)          # full extent if small, else mult of 8
    num_tiles = pl.cdiv(g_total, tile_g)       # partial tail block is fine (rows sliced off)

    out = pl.pallas_call(
        linear_kernel,
        out_shape=jax.ShapeDtypeStruct((g_total, GROUP), jnp.float32),
        grid=(num_tiles,),
        in_specs=[
            # lane-dense x tile: batch-group blocked, full 1280-lane extent.
            pl.BlockSpec((tile_g, DENSE_COLS), lambda i: (i, 0)),
            # block-diagonal weight: same block every step -> resident in VMEM (~640 KiB).
            pl.BlockSpec((DENSE_COLS, GROUP), lambda i: (0, 0)),
            # bias scalar in SMEM.
            pl.BlockSpec(memory_space=pltpu.MemorySpace.SMEM),
        ],
        out_specs=pl.BlockSpec((tile_g, GROUP), lambda i: (i, 0)),
        compiler_params=pltpu.CompilerParams(
            # Batch tiles are independent -> shard across TensorCores on v7x megacore.
            dimension_semantics=("parallel",),
        ),
        cost_estimate=pl.CostEstimate(
            flops=2 * Bp * IN_FEATURES * OUT_FEATURES,
            transcendentals=0,
            bytes_accessed=Bp * IN_FEATURES * 4 + Bp * 4 + DENSE_COLS * GROUP * 4,
        ),
    )(x_dense, w_blk, b_sc)

    out = out.reshape(Bp, OUT_FEATURES)[:B]
    return out.astype(x.dtype).reshape(*lead_shape, OUT_FEATURES)


if __name__ == "__main__":
    key = jax.random.PRNGKey(0)
    kx, kw, kb, kx2 = jax.random.split(key, 4)

    # Deterministic parameter init mimicking torch.nn.Linear's U(-1/sqrt(in), 1/sqrt(in)).
    bound = 1.0 / (IN_FEATURES ** 0.5)
    w = jax.random.uniform(kw, (OUT_FEATURES, IN_FEATURES),
                           minval=-bound, maxval=bound, dtype=jnp.float32)
    b = jax.random.uniform(kb, (OUT_FEATURES,),
                           minval=-bound, maxval=bound, dtype=jnp.float32)

    # Small primary test (batch=8).
    batch = 8
    x = jax.random.normal(kx, (batch, IN_FEATURES), dtype=jnp.float32)
    out = linear_pallas(x, w, b)
    jax.block_until_ready(out)
    ref = x @ w.T + b
    assert out.shape == (batch, OUT_FEATURES)
    assert jnp.allclose(out, ref, atol=1e-5, rtol=1e-5)

    # Secondary test exercising the pad-to-128 + multi-group path (batch=300).
    x2 = jax.random.normal(kx2, (300, IN_FEATURES), dtype=jnp.float32)
    out2 = linear_pallas(x2, w, b)
    jax.block_until_ready(out2)
    ref2 = x2 @ w.T + b
    assert out2.shape == (300, OUT_FEATURES)
    assert jnp.allclose(out2, ref2, atol=1e-5, rtol=1e-5)

    print("KERNEL_OK")
</pallas_src>

<mosaic_0001>
module attributes {stable_mosaic.version = 11 : i64} {
  func.func @linear_kernel(%arg0: i32, %arg1: memref<1x1280xf32, #tpu.memory_space<vmem>>, %arg2: memref<1280x128xf32, #tpu.memory_space<vmem>>, %arg3: memref<1x1xf32, #tpu.memory_space<smem>>, %arg4: memref<1x128xf32, #tpu.memory_space<vmem>>) attributes {dimension_semantics = [#tpu.dimension_semantics<parallel>], iteration_bounds = array<i64: 1>, scalar_prefetch = 0 : i64, scratch_operands = 0 : i64, tpu.core_type = #tpu.core_type<tc>, window_params = [{transform_indices = @transform_0, window_bounds = array<i64: 1, 1280>}, {pipeline_mode = #tpu.pipeline_mode<synchronous>, transform_indices = @transform_1, window_bounds = array<i64: 1280, 128>}, {transform_indices = @transform_2, window_bounds = array<i64: 1, 1>}, {transform_indices = @transform_3, window_bounds = array<i64: 1, 128>}]} {
    %c0 = arith.constant 0 : index
    %c0_0 = arith.constant 0 : index
    %0 = vector.load %arg1[%c0, %c0_0] : memref<1x1280xf32, #tpu.memory_space<vmem>>, vector<1x1280xf32>
    %c0_1 = arith.constant 0 : index
    %c0_2 = arith.constant 0 : index
    %1 = vector.load %arg2[%c0_1, %c0_2] : memref<1280x128xf32, #tpu.memory_space<vmem>>, vector<1280x128xf32>
    %cst = arith.constant dense<0.000000e+00> : vector<1x128xf32>
    %2 = tpu.matmul %0, %1, %cst {dimension_numbers = #tpu.dot_dimension_numbers<[1], [0], [0], [1], [0, 0, 1, 1], [], []>} : vector<1x1280xf32>, vector<1280x128xf32>, vector<1x128xf32> -> vector<1x128xf32>
    %c0_3 = arith.constant 0 : index
    %c0_4 = arith.constant 0 : index
    %3 = memref.load %arg3[%c0_3, %c0_4] : memref<1x1xf32, #tpu.memory_space<smem>>
    %4 = vector.broadcast %3 : f32 to vector<1x128xf32>
    %5 = arith.addf %2, %4 : vector<1x128xf32>
    %c0_5 = arith.constant 0 : index
    %c0_6 = arith.constant 0 : index
    %6 = vector.load %arg4[%c0_5, %c0_6] : memref<1x128xf32, #tpu.memory_space<vmem>>, vector<1x128xf32>
    tpu.vector_store %arg4[%c0_5, %c0_6], %5 {strides = array<i32>} : memref<1x128xf32, #tpu.memory_space<vmem>>, vector<1x128xf32>,
    return
  }
  func.func @transform_0(%arg0: i32) -> (i32, i32) {
    %c0_i32 = arith.constant 0 : i32
    %c0_i32_0 = arith.constant 0 : i32
    return %arg0, %c0_i32 : i32, i32
  }
  func.func @transform_1(%arg0: i32) -> (i32, i32) {
    %c0_i32 = arith.constant 0 : i32
    %c0_i32_0 = arith.constant 0 : i32
    %c0_i32_1 = arith.constant 0 : i32
    return %c0_i32, %c0_i32_0 : i32, i32
  }
  func.func @transform_2(%arg0: i32) -> (i32, i32) {
    %c0_i32 = arith.constant 0 : i32
    %c0_i32_0 = arith.constant 0 : i32
    %c0_i32_1 = arith.constant 0 : i32
    return %c0_i32, %c0_i32_0 : i32, i32
  }
  func.func @transform_3(%arg0: i32) -> (i32, i32) {
    %c0_i32 = arith.constant 0 : i32
    %c0_i32_0 = arith.constant 0 : i32
    return %arg0, %c0_i32 : i32, i32
  }
}

</mosaic_0001>

<bundles_post_ra>
// kernel: tpu_custom_call.1
= control target key start
LH: loop header
LB: loop body
LE: loop exit
PB: predicated region body
PF: predicated region fallthrough
CT: control target
= control target key end

     0   :  { %9 = vsyncpa [#allocation4], 0  ;;  %s581_s0 = inlined_call_operand.hbm [shape: f32[1,1280], index: 0, kind: input, shape index: {}]   ;;  %s582_s1 = inlined_call_operand.hbm [shape: f32[1280,128], index: 1, kind: input, shape index: {}]   ;;  %s583_s2 = inlined_call_operand.<no memory space> [shape: f32[1,1], index: 2, kind: input, shape index: {}]   ;;  %s584_s3 = inlined_call_operand.hbm [shape: f32[1,128], index: 3, kind: output, shape index: {}]  }
   0x1   :  { %10 = vsyncpa [#allocation7], 0 }
   0x2   :  { %11 = vsyncpa [#allocation5], 0  ;;  %s17_s14 = sshll.u32 %s581_s0, 4  ;;  %s534_s15 = smov [#allocation3]   ;;  %s18_s14 = int_to_ptr.hbm [resolvable:$true] %s17_s14 }
   0x3   :  { %s19_s16 = sshll.u32 %s534_s15, 4  ;;  %s27_s19 = sshll.u32 %s582_s1, 4  ;;  %s20_s16 = int_to_ptr.vmem [resolvable:$true] %s19_s16  ;;  %s28_s19 = int_to_ptr.hbm [resolvable:$true] %s27_s19 }
   0x4   :  { %22 = dma.hbm_to_vmem [thread:$0]  %s18_s14, 160, %s20_s16, [#allocation4]  }
   0x5   :  { %s535_s20 = smov [#allocation6]   ;;  %s536_s22 = smov 128  }
   0x6   :  { %s29_s21 = sshll.u32 %s535_s20, 4  ;;  %s537_s23 = smov 8   ;;  %s30_s21 = int_to_ptr.vmem [resolvable:$true] %s29_s21 }
   0x7   :  { %35 = dma.hbm_to_vmem [thread:$0]  %s28_s19, 20480, %s30_s21, [#allocation7], %s536_s22, %s536_s22, %s537_s23  }
   0x8   :  { %528 = dma.done.wait [#allocation4], 160  }
   0x9   :  { %529 = vsyncadd [#allocation4], 4294967136 }
   0xa   :  { %530 = dma.done.wait [#allocation7], 20480  }
   0xb   :  { %531 = vsyncadd [#allocation7], 4294946816  ;;  %v63_v0 = vld [vmem:[#allocation6 + $0x78] sm:$0xff]  ;;  %v62_v1 = vld [vmem:[#allocation6 + $0x70] sm:$0xff]  ;;  %s538_s24 = smov [#allocation8]   ;;  %s440_s27 = sshll.u32 %s584_s3, 4  ;;  %s441_s27 = int_to_ptr.hbm [resolvable:$true] %s440_s27 }
   0xc   :  { %v79_v2 = vld [vmem:[#allocation6 + $0xf8] sm:$0xff]  ;;  %232 = vmatpush.msra.mxu0 %v63_v0  ;;  %v78_v3 = vld [vmem:[#allocation6 + $0xf0] sm:$0xff]  ;;  %v61_v4 = vld [vmem:[#allocation6 + $0x68] sm:$0xff]  ;;  %s438_s25 = sshll.u32 %s538_s24, 4  ;;  %s439_s25 = int_to_ptr.vmem [resolvable:$true] %s438_s25 }
   0xd   :  { %252 = vmatpush.msra.mxu1 %v79_v2  ;;  %v77_v5 = vld [vmem:[#allocation6 + $0xe8] sm:$0xff]  ;;  %v95_v6 = vld [vmem:[#allocation6 + $0x178] sm:$0xff]  ;;  %v94_v7 = vld [vmem:[#allocation6 + $0x170] sm:$0xff] }
   0xe   :  { %233 = vmatpush.msra.mxu0 %v62_v1  ;;  %v111_v8 = vld [vmem:[#allocation6 + $0x1f8] sm:$0xff]  ;;  %v60_v9 = vld [vmem:[#allocation6 + $0x60] sm:$0xff]  ;;  %272 = vmatpush.msra.mxu2 %v95_v6  ;;  %v93_v11 = vld [vmem:[#allocation6 + $0x168] sm:$0xff] }
   0xf   :  { %253 = vmatpush.msra.mxu1 %v78_v3  ;;  %v76_v10 = vld [vmem:[#allocation6 + $0xe0] sm:$0xff]  ;;  %292 = vmatpush.msra.mxu3 %v111_v8  ;;  %v110_v12 = vld [vmem:[#allocation6 + $0x1f0] sm:$0xff]  ;;  %v59_v13 = vld [vmem:[#allocation6 + $0x58] sm:$0xff] }
  0x10   :  { %234 = vmatpush.msra.mxu0 %v61_v4  ;;  %273 = vmatpush.msra.mxu2 %v94_v7  ;;  %v75_v14 = vld [vmem:[#allocation6 + $0xd8] sm:$0xff]  ;;  %v109_v15 = vld [vmem:[#allocation6 + $0x1e8] sm:$0xff]  ;;  %v92_v16 = vld [vmem:[#allocation6 + $0x160] sm:$0xff] }
  0x11   :  { %254 = vmatpush.msra.mxu1 %v77_v5  ;;  %293 = vmatpush.msra.mxu3 %v110_v12  ;;  %v108_v17 = vld [vmem:[#allocation6 + $0x1e0] sm:$0xff]  ;;  %v58_v18 = vld [vmem:[#allocation6 + $0x50] sm:$0xff]  ;;  %v91_v20 = vld [vmem:[#allocation6 + $0x158] sm:$0xff] }
  0x12   :  { %235 = vmatpush.msra.mxu0 %v60_v9  ;;  %274 = vmatpush.msra.mxu2 %v93_v11  ;;  %v74_v19 = vld [vmem:[#allocation6 + $0xd0] sm:$0xff]  ;;  %v107_v21 = vld [vmem:[#allocation6 + $0x1d8] sm:$0xff]  ;;  %v57_v22 = vld [vmem:[#allocation6 + $0x48] sm:$0xff] }
  0x13   :  { %255 = vmatpush.msra.mxu1 %v76_v10  ;;  %294 = vmatpush.msra.mxu3 %v109_v15  ;;  %v73_v23 = vld [vmem:[#allocation6 + $0xc8] sm:$0xff]  ;;  %v90_v24 = vld [vmem:[#allocation6 + $0x150] sm:$0xff]  ;;  %v56_v26 = vld [vmem:[#allocation6 + $0x40] sm:$0xff] }
  0x14   :  { %236 = vmatpush.msra.mxu0 %v59_v13  ;;  %275 = vmatpush.msra.mxu2 %v92_v16  ;;  %v106_v25 = vld [vmem:[#allocation6 + $0x1d0] sm:$0xff]  ;;  %v72_v27 = vld [vmem:[#allocation6 + $0xc0] sm:$0xff]  ;;  %v89_v28 = vld [vmem:[#allocation6 + $0x148] sm:$0xff] }
  0x15   :  { %256 = vmatpush.msra.mxu1 %v75_v14  ;;  %295 = vmatpush.msra.mxu3 %v108_v17  ;;  %v105_v29 = vld [vmem:[#allocation6 + $0x1c8] sm:$0xff]  ;;  %v55_v30 = vld [vmem:[#allocation6 + $0x38] sm:$0xff]  ;;  %v88_v32 = vld [vmem:[#allocation6 + $0x140] sm:$0xff] }
  0x16   :  { %237 = vmatpush.msra.mxu0 %v58_v18  ;;  %276 = vmatpush.msra.mxu2 %v91_v20  ;;  %v71_v31 = vld [vmem:[#allocation6 + $0xb8] sm:$0xff]  ;;  %v104_v33 = vld [vmem:[#allocation6 + $0x1c0] sm:$0xff]  ;;  %v54_v34 = vld [vmem:[#allocation6 + $0x30] sm:$0xff] }
  0x17   :  { %257 = vmatpush.msra.mxu1 %v74_v19  ;;  %296 = vmatpush.msra.mxu3 %v107_v21  ;;  %v70_v35 = vld [vmem:[#allocation6 + $0xb0] sm:$0xff]  ;;  %v87_v36 = vld [vmem:[#allocation6 + $0x138] sm:$0xff]  ;;  %v53_v38 = vld [vmem:[#allocation6 + $0x28] sm:$0xff] }
  0x18   :  { %238 = vmatpush.msra.mxu0 %v57_v22  ;;  %277 = vmatpush.msra.mxu2 %v90_v24  ;;  %v103_v37 = vld [vmem:[#allocation6 + $0x1b8] sm:$0xff]  ;;  %v69_v39 = vld [vmem:[#allocation6 + $0xa8] sm:$0xff]  ;;  %v86_v40 = vld [vmem:[#allocation6 + $0x130] sm:$0xff] }
  0x19   :  { %258 = vmatpush.msra.mxu1 %v73_v23  ;;  %297 = vmatpush.msra.mxu3 %v106_v25  ;;  %v102_v41 = vld [vmem:[#allocation6 + $0x1b0] sm:$0xff]  ;;  %v52_v42 = vld [vmem:[#allocation6 + $0x20] sm:$0xff]  ;;  %v85_v44 = vld [vmem:[#allocation6 + $0x128] sm:$0xff] }
  0x1a   :  { %239 = vmatpush.msra.mxu0 %v56_v26  ;;  %278 = vmatpush.msra.mxu2 %v89_v28  ;;  %v68_v43 = vld [vmem:[#allocation6 + $0xa0] sm:$0xff]  ;;  %v101_v45 = vld [vmem:[#allocation6 + $0x1a8] sm:$0xff]  ;;  %v51_v46 = vld [vmem:[#allocation6 + $0x18] sm:$0xff] }
  0x1b   :  { %259 = vmatpush.msra.mxu1 %v72_v27  ;;  %298 = vmatpush.msra.mxu3 %v105_v29  ;;  %v67_v47 = vld [vmem:[#allocation6 + $0x98] sm:$0xff]  ;;  %v84_v48 = vld [vmem:[#allocation6 + $0x120] sm:$0xff]  ;;  %v50_v50 = vld [vmem:[#allocation6 + $0x10] sm:$0xff] }
  0x1c   :  { %240 = vmatpush.msra.mxu0 %v55_v30  ;;  %279 = vmatpush.msra.mxu2 %v88_v32  ;;  %v100_v49 = vld [vmem:[#allocation6 + $0x1a0] sm:$0xff]  ;;  %v66_v51 = vld [vmem:[#allocation6 + $0x90] sm:$0xff]  ;;  %v83_v52 = vld [vmem:[#allocation6 + $0x118] sm:$0xff] }
  0x1d   :  { %260 = vmatpush.msra.mxu1 %v71_v31  ;;  %299 = vmatpush.msra.mxu3 %v104_v33  ;;  %v99_v53 = vld [vmem:[#allocation6 + $0x198] sm:$0xff]  ;;  %v49_v54 = vld [vmem:[#allocation6 + $0x8] sm:$0xff]  ;;  %v82_v56 = vld [vmem:[#allocation6 + $0x110] sm:$0xff] }
  0x1e   :  { %241 = vmatpush.msra.mxu0 %v54_v34  ;;  %280 = vmatpush.msra.mxu2 %v87_v36  ;;  %v65_v55 = vld [vmem:[#allocation6 + $0x88] sm:$0xff]  ;;  %v98_v57 = vld [vmem:[#allocation6 + $0x190] sm:$0xff]  ;;  %v48_v58 = vld [vmem:[#allocation6] sm:$0xff] }
  0x1f   :  { %261 = vmatpush.msra.mxu1 %v70_v35  ;;  %300 = vmatpush.msra.mxu3 %v103_v37  ;;  %v64_v59 = vld [vmem:[#allocation6 + $0x80] sm:$0xff]  ;;  %v127_v60 = vld [vmem:[#allocation6 + $0x278] sm:$0xff]  ;;  %v81_v62 = vld [vmem:[#allocation6 + $0x108] sm:$0xff] }
  0x20   :  { %242 = vmatpush.msra.mxu0 %v53_v38  ;;  %281 = vmatpush.msra.mxu2 %v86_v40  ;;  %v143_v61 = vld [vmem:[#allocation6 + $0x2f8] sm:$0xff]  ;;  %v97_v63 = vld [vmem:[#allocation6 + $0x188] sm:$0xff]  ;;  %v126_v0 = vld [vmem:[#allocation6 + $0x270] sm:$0xff] }
  0x21   :  { %262 = vmatpush.msra.mxu1 %v69_v39  ;;  %301 = vmatpush.msra.mxu3 %v102_v41  ;;  %v142_v1 = vld [vmem:[#allocation6 + $0x2f0] sm:$0xff]  ;;  %v80_v2 = vld [vmem:[#allocation6 + $0x100] sm:$0xff]  ;;  %v125_v4 = vld [vmem:[#allocation6 + $0x268] sm:$0xff] }
  0x22   :  { %243 = vmatpush.msra.mxu0 %v52_v42  ;;  %282 = vmatpush.msra.mxu2 %v85_v44  ;;  %v96_v3 = vld [vmem:[#allocation6 + $0x180] sm:$0xff]  ;;  %v141_v5 = vld [vmem:[#allocation6 + $0x2e8] sm:$0xff]  ;;  %v159_v6 = vld [vmem:[#allocation6 + $0x378] sm:$0xff] }
  0x23   :  { %263 = vmatpush.msra.mxu1 %v68_v43  ;;  %302 = vmatpush.msra.mxu3 %v101_v45  ;;  %v175_v7 = vld [vmem:[#allocation6 + $0x3f8] sm:$0xff]  ;;  %v124_v8 = vld [vmem:[#allocation6 + $0x260] sm:$0xff]  ;;  %v158_v10 = vld [vmem:[#allocation6 + $0x370] sm:$0xff] }
  0x24   :  { %244 = vmatpush.msra.mxu0 %v51_v46  ;;  %283 = vmatpush.msra.mxu2 %v84_v48  ;;  %v140_v9 = vld [vmem:[#allocation6 + $0x2e0] sm:$0xff]  ;;  %v174_v11 = vld [vmem:[#allocation6 + $0x3f0] sm:$0xff]  ;;  %v123_v12 = vld [vmem:[#allocation6 + $0x258] sm:$0xff] }
  0x25   :  { %264 = vmatpush.msra.mxu1 %v67_v47  ;;  %303 = vmatpush.msra.mxu3 %v100_v49  ;;  %v139_v13 = vld [vmem:[#allocation6 + $0x2d8] sm:$0xff]  ;;  %v157_v14 = vld [vmem:[#allocation6 + $0x368] sm:$0xff]  ;;  %v122_v16 = vld [vmem:[#allocation6 + $0x250] sm:$0xff] }
  0x26   :  { %245 = vmatpush.msra.mxu0 %v50_v50  ;;  %284 = vmatpush.msra.mxu2 %v83_v52  ;;  %v173_v15 = vld [vmem:[#allocation6 + $0x3e8] sm:$0xff]  ;;  %v138_v17 = vld [vmem:[#allocation6 + $0x2d0] sm:$0xff]  ;;  %v156_v18 = vld [vmem:[#allocation6 + $0x360] sm:$0xff] }
  0x27   :  { %265 = vmatpush.msra.mxu1 %v66_v51  ;;  %304 = vmatpush.msra.mxu3 %v99_v53  ;;  %v172_v19 = vld [vmem:[#allocation6 + $0x3e0] sm:$0xff]  ;;  %v121_v20 = vld [vmem:[#allocation6 + $0x248] sm:$0xff]  ;;  %v155_v22 = vld [vmem:[#allocation6 + $0x358] sm:$0xff] }
  0x28   :  { %246 = vmatpush.msra.mxu0 %v49_v54  ;;  %285 = vmatpush.msra.mxu2 %v82_v56  ;;  %v137_v21 = vld [vmem:[#allocation6 + $0x2c8] sm:$0xff]  ;;  %v171_v23 = vld [vmem:[#allocation6 + $0x3d8] sm:$0xff]  ;;  %v120_v24 = vld [vmem:[#allocation6 + $0x240] sm:$0xff] }
  0x29   :  { %266 = vmatpush.msra.mxu1 %v65_v55  ;;  %305 = vmatpush.msra.mxu3 %v98_v57  ;;  %v136_v25 = vld [vmem:[#allocation6 + $0x2c0] sm:$0xff]  ;;  %v154_v26 = vld [vmem:[#allocation6 + $0x350] sm:$0xff]  ;;  %v119_v28 = vld [vmem:[#allocation6 + $0x238] sm:$0xff] }
  0x2a   :  { %247 = vmatpush.msra.mxu0 %v48_v58  ;;  %286 = vmatpush.msra.mxu2 %v81_v62  ;;  %v170_v27 = vld [vmem:[#allocation6 + $0x3d0] sm:$0xff]  ;;  %v135_v29 = vld [vmem:[#allocation6 + $0x2b8] sm:$0xff]  ;;  %v153_v30 = vld [vmem:[#allocation6 + $0x348] sm:$0xff] }
  0x2b   :  { %267 = vmatpush.msra.mxu1 %v64_v59  ;;  %306 = vmatpush.msra.mxu3 %v97_v63  ;;  %v169_v31 = vld [vmem:[#allocation6 + $0x3c8] sm:$0xff]  ;;  %v118_v32 = vld [vmem:[#allocation6 + $0x230] sm:$0xff]  ;;  %v152_v34 = vld [vmem:[#allocation6 + $0x340] sm:$0xff] }
  0x2c   :  { %312 = vmatpush.msrb.mxu0 %v127_v60  ;;  %287 = vmatpush.msra.mxu2 %v80_v2  ;;  %v134_v33 = vld [vmem:[#allocation6 + $0x2b0] sm:$0xff]  ;;  %v168_v35 = vld [vmem:[#allocation6 + $0x3c0] sm:$0xff]  ;;  %v117_v36 = vld [vmem:[#allocation6 + $0x228] sm:$0xff] }
  0x2d   :  { %332 = vmatpush.msrb.mxu1 %v143_v61  ;;  %307 = vmatpush.msra.mxu3 %v96_v3  ;;  %v133_v37 = vld [vmem:[#allocation6 + $0x2a8] sm:$0xff]  ;;  %v151_v38 = vld [vmem:[#allocation6 + $0x338] sm:$0xff]  ;;  %v116_v40 = vld [vmem:[#allocation6 + $0x220] sm:$0xff] }
  0x2e   :  { %313 = vmatpush.msrb.mxu0 %v126_v0  ;;  %352 = vmatpush.msrb.mxu2 %v159_v6  ;;  %v167_v39 = vld [vmem:[#allocation6 + $0x3b8] sm:$0xff]  ;;  %v132_v41 = vld [vmem:[#allocation6 + $0x2a0] sm:$0xff]  ;;  %v150_v42 = vld [vmem:[#allocation6 + $0x330] sm:$0xff] }
  0x2f   :  { %333 = vmatpush.msrb.mxu1 %v142_v1  ;;  %372 = vmatpush.msrb.mxu3 %v175_v7  ;;  %v166_v43 = vld [vmem:[#allocation6 + $0x3b0] sm:$0xff]  ;;  %v115_v44 = vld [vmem:[#allocation6 + $0x218] sm:$0xff]  ;;  %v149_v47 = vld [vmem:[#allocation6 + $0x328] sm:$0xff] }
  0x30   :  { %314 = vmatpush.msrb.mxu0 %v125_v4  ;;  %353 = vmatpush.msrb.mxu2 %v158_v10  ;;  %v131_v45 = vld [vmem:[#allocation6 + $0x298] sm:$0xff]  ;;  %v165_v48 = vld [vmem:[#allocation6 + $0x3a8] sm:$0xff]  ;;  %v114_v49 = vld [vmem:[#allocation6 + $0x210] sm:$0xff] }
  0x31   :  { %334 = vmatpush.msrb.mxu1 %v141_v5  ;;  %373 = vmatpush.msrb.mxu3 %v174_v11  ;;  %v565_v46 = vld [vmem:[#allocation3] sm:$0xff]  ;;  %v148_v51 = vld [vmem:[#allocation6 + $0x320] sm:$0xff]  ;;  %v113_v54 = vld [vmem:[#allocation6 + $0x208] sm:$0xff] }
  0x32   :  { %315 = vmatpush.msrb.mxu0 %v124_v8  ;;  %354 = vmatpush.msrb.mxu2 %v157_v14  ;;  %v130_v50 = vld [vmem:[#allocation6 + $0x290] sm:$0xff]  ;;  %v214_v52 = vperm.slane %v565_v46, 2  ;;  %v164_v53 = vld [vmem:[#allocation6 + $0x3a0] sm:$0xff]  ;;  %v129_v55 = vld [vmem:[#allocation6 + $0x288] sm:$0xff]  ;;  %v215_v57 = vperm.slane %v565_v46, 3  ;;  %v212_v59 = vperm.slane %v565_v46, 0 }
  0x33   :  { %335 = vmatpush.msrb.mxu1 %v140_v9  ;;  %374 = vmatpush.msrb.mxu3 %v173_v15  ;;  %v147_v56 = vld [vmem:[#allocation6 + $0x318] sm:$0xff]  ;;  %v112_v58 = vld [vmem:[#allocation6 + $0x200] sm:$0xff]  ;;  %v146_v62 = vld [vmem:[#allocation6 + $0x310] sm:$0xff]  ;;  %v213_v63 = vperm.slane %v565_v46, 1  ;;  %v218_v9 = vperm.slane %v565_v46, 6  ;;  %v219_v14 = vperm.slane %v565_v46, 7 }
  0x34   :  { %316 = vmatpush.msrb.mxu0 %v123_v12  ;;  %355 = vmatpush.msrb.mxu2 %v156_v18  ;;  %v128_v60 = vld [vmem:[#allocation6 + $0x280] sm:$0xff]  ;;  %v191_v61 = vld [vmem:[#allocation6 + $0x478] sm:$0xff]  ;;  %v190_v1 = vld [vmem:[#allocation6 + $0x470] sm:$0xff] }
  0x35   :  { %336 = vmatpush.msrb.mxu1 %v139_v13  ;;  %375 = vmatpush.msrb.mxu3 %v172_v19  ;;  %v163_v0 = vld [vmem:[#allocation6 + $0x398] sm:$0xff]  ;;  %v145_v3 = vld [vmem:[#allocation6 + $0x308] sm:$0xff]  ;;  %v162_v4 = vld [vmem:[#allocation6 + $0x390] sm:$0xff]  ;;  %v216_v13 = vperm.slane %v565_v46, 4 }
  0x36   :  { %317 = vmatpush.msrb.mxu0 %v122_v16  ;;  %356 = vmatpush.msrb.mxu2 %v155_v22  ;;  %v207_v2 = vld [vmem:[#allocation6 + $0x4f8] sm:$0xff]  ;;  %v189_v5 = vld [vmem:[#allocation6 + $0x468] sm:$0xff]  ;;  %v206_v6 = vld [vmem:[#allocation6 + $0x4f0] sm:$0xff] }
  0x37   :  { %337 = vmatpush.msrb.mxu1 %v138_v17  ;;  %376 = vmatpush.msrb.mxu3 %v171_v23  ;;  %v144_v7 = vld [vmem:[#allocation6 + $0x300] sm:$0xff]  ;;  %v161_v8 = vld [vmem:[#allocation6 + $0x388] sm:$0xff]  ;;  %v187_v15 = vld [vmem:[#allocation6 + $0x458] sm:$0xff]  ;;  %v217_v17 = vperm.slane %v565_v46, 5 }
  0x38   :  { %318 = vmatpush.msrb.mxu0 %v121_v20  ;;  %357 = vmatpush.msrb.mxu2 %v154_v26  ;;  %v188_v10 = vld [vmem:[#allocation6 + $0x460] sm:$0xff]  ;;  %v205_v11 = vld [vmem:[#allocation6 + $0x4e8] sm:$0xff]  ;;  %v186_v18 = vld [vmem:[#allocation6 + $0x450] sm:$0xff] }
  0x39   :  { %338 = vmatpush.msrb.mxu1 %v137_v21  ;;  %377 = vmatpush.msrb.mxu3 %v170_v27  ;;  %v160_v12 = vld [vmem:[#allocation6 + $0x380] sm:$0xff]  ;;  %v203_v19 = vld [vmem:[#allocation6 + $0x4d8] sm:$0xff]  ;;  %v185_v20 = vld [vmem:[#allocation6 + $0x448] sm:$0xff] }
  0x3a   :  { %319 = vmatpush.msrb.mxu0 %v120_v24  ;;  %358 = vmatpush.msrb.mxu2 %v153_v30  ;;  %v204_v16 = vld [vmem:[#allocation6 + $0x4e0] sm:$0xff]  ;;  %v202_v21 = vld [vmem:[#allocation6 + $0x4d0] sm:$0xff]  ;;  %v201_v23 = vld [vmem:[#allocation6 + $0x4c8] sm:$0xff] }
  0x3b   :  { %339 = vmatpush.msrb.mxu1 %v136_v25  ;;  %378 = vmatpush.msrb.mxu3 %v169_v31  ;;  %v184_v22 = vld [vmem:[#allocation6 + $0x440] sm:$0xff]  ;;  %v183_v24 = vld [vmem:[#allocation6 + $0x438] sm:$0xff]  ;;  %v182_v26 = vld [vmem:[#allocation6 + $0x430] sm:$0xff] }
  0x3c   :  { %320 = vmatpush.msrb.mxu0 %v119_v28  ;;  %359 = vmatpush.msrb.mxu2 %v152_v34  ;;  %v200_v25 = vld [vmem:[#allocation6 + $0x4c0] sm:$0xff]  ;;  %v199_v27 = vld [vmem:[#allocation6 + $0x4b8] sm:$0xff]  ;;  %v181_v28 = vld [vmem:[#allocation6 + $0x428] sm:$0xff] }
  0x3d   :  { %340 = vmatpush.msrb.mxu1 %v135_v29  ;;  %379 = vmatpush.msrb.mxu3 %v168_v35  ;;  %v198_v29 = vld [vmem:[#allocation6 + $0x4b0] sm:$0xff]  ;;  %v180_v30 = vld [vmem:[#allocation6 + $0x420] sm:$0xff]  ;;  %v197_v31 = vld [vmem:[#allocation6 + $0x4a8] sm:$0xff] }
  0x3e   :  { %321 = vmatpush.msrb.mxu0 %v118_v32  ;;  %360 = vmatpush.msrb.mxu2 %v151_v38  ;;  %v179_v32 = vld [vmem:[#allocation6 + $0x418] sm:$0xff]  ;;  %v178_v34 = vld [vmem:[#allocation6 + $0x410] sm:$0xff] }
  0x3f   :  { %341 = vmatpush.msrb.mxu1 %v134_v33  ;;  %380 = vmatpush.msrb.mxu3 %v167_v39  ;;  %v196_v33 = vld [vmem:[#allocation6 + $0x4a0] sm:$0xff]  ;;  %v195_v35 = vld [vmem:[#allocation6 + $0x498] sm:$0xff]  ;;  %v194_v38 = vld [vmem:[#allocation6 + $0x490] sm:$0xff] }
  0x40   :  { %322 = vmatpush.msrb.mxu0 %v117_v36  ;;  %361 = vmatpush.msrb.mxu2 %v150_v42  ;;  %v47_v36 = vld [vmem:[#allocation3 + $0x8] sm:$0x3]  ;;  %v176_v39 = vld [vmem:[#allocation6 + $0x400] sm:$0xff] }
  0x41   :  { %342 = vmatpush.msrb.mxu1 %v133_v37  ;;  %381 = vmatpush.msrb.mxu3 %v166_v43  ;;  %v177_v37 = vld [vmem:[#allocation6 + $0x408] sm:$0xff]  ;;  %v192_v42 = vld [vmem:[#allocation6 + $0x480] sm:$0xff]  ;;  %v221_v43 = vperm.slane %v47_v36, 1 }
  0x42   :  { %323 = vmatpush.msrb.mxu0 %v116_v40  ;;  %362 = vmatpush.msrb.mxu2 %v149_v47  ;;  %v193_v40 = vld [vmem:[#allocation6 + $0x488] sm:$0xff] }
  0x43   :  { %343 = vmatpush.msrb.mxu1 %v132_v41  ;;  %382 = vmatpush.msrb.mxu3 %v165_v48  ;;  %v220_v41 = vperm.slane %v47_v36, 0 }
  0x44   :  { %324 = vmatpush.msrb.mxu0 %v115_v44  ;;  %363 = vmatpush.msrb.mxu2 %v148_v51  ;;  %v209_v44 = vstv %s583_s2 }
  0x45   :  { %344 = vmatpush.msrb.mxu1 %v131_v45  ;;  %383 = vmatpush.msrb.mxu3 %v164_v53 }
  0x46   :  { %325 = vmatpush.msrb.mxu0 %v114_v49  ;;  %288 = vmatmul.f32.vlgmr.msra.gmra.mxu2 %v214_v52 }
  0x47   :  { %345 = vmatpush.msrb.mxu1 %v130_v50  ;;  %364 = vmatpush.msrb.mxu2 %v147_v56 }
  0x48   :  { %326 = vmatpush.msrb.mxu0 %v113_v54  ;;  %308 = vmatmul.f32.vlgmr.msra.gmra.mxu3 %v215_v57 }
  0x49   :  { %346 = vmatpush.msrb.mxu1 %v129_v55  ;;  %248 = vmatmul.f32.vlgmr.msra.gmra.mxu0 %v212_v59 }
  0x4a   :  { %327 = vmatpush.msrb.mxu0 %v112_v58  ;;  %365 = vmatpush.msrb.mxu2 %v146_v62 }
  0x4b   :  { %347 = vmatpush.msrb.mxu1 %v128_v60  ;;  %384 = vmatpush.msrb.mxu3 %v163_v0 }
  0x4c   :  { %392 = vmatpush.msra.mxu0 %v191_v61  ;;  %268 = vmatmul.f32.vlgmr.msra.gmra.mxu1 %v213_v63 }
  0x4d   :  { %412 = vmatpush.msra.mxu1 %v207_v2  ;;  %366 = vmatpush.msrb.mxu2 %v145_v3 }
  0x4e   :  { %393 = vmatpush.msra.mxu0 %v190_v1  ;;  %385 = vmatpush.msrb.mxu3 %v162_v4 }
  0x4f   :  { %413 = vmatpush.msra.mxu1 %v206_v6  ;;  %367 = vmatpush.msrb.mxu2 %v144_v7 }
  0x50   :  { %394 = vmatpush.msra.mxu0 %v189_v5  ;;  %386 = vmatpush.msrb.mxu3 %v161_v8 }
  0x51   :  { %368 = vmatmul.f32.vlgmr.msrb.gmra.mxu2 %v218_v9  ;;  %414 = vmatpush.msra.mxu1 %v205_v11 }
  0x52   :  { %395 = vmatpush.msra.mxu0 %v188_v10  ;;  %387 = vmatpush.msrb.mxu3 %v160_v12 }
  0x53   :  { %328 = vmatmul.f32.vlgmr.msrb.gmra.mxu0 %v216_v13  ;;  %388 = vmatmul.f32.vlgmr.msrb.gmra.mxu3 %v219_v14 }
  0x54   :  { %396 = vmatpush.msra.mxu0 %v187_v15  ;;  %415 = vmatpush.msra.mxu1 %v204_v16 }
  0x55   :  { %348 = vmatmul.f32.vlgmr.msrb.gmra.mxu1 %v217_v17 }
  0x56   :  { %397 = vmatpush.msra.mxu0 %v186_v18  ;;  %416 = vmatpush.msra.mxu1 %v203_v19 }
  0x58   :  { %398 = vmatpush.msra.mxu0 %v185_v20  ;;  %417 = vmatpush.msra.mxu1 %v202_v21 }
  0x5a   :  { %399 = vmatpush.msra.mxu0 %v184_v22  ;;  %418 = vmatpush.msra.mxu1 %v201_v23 }
  0x5c   :  { %400 = vmatpush.msra.mxu0 %v183_v24  ;;  %419 = vmatpush.msra.mxu1 %v200_v25 }
  0x5e   :  { %401 = vmatpush.msra.mxu0 %v182_v26  ;;  %420 = vmatpush.msra.mxu1 %v199_v27 }
  0x60   :  { %402 = vmatpush.msra.mxu0 %v181_v28  ;;  %421 = vmatpush.msra.mxu1 %v198_v29 }
  0x62   :  { %403 = vmatpush.msra.mxu0 %v180_v30  ;;  %422 = vmatpush.msra.mxu1 %v197_v31 }
  0x64   :  { %404 = vmatpush.msra.mxu0 %v179_v32  ;;  %423 = vmatpush.msra.mxu1 %v196_v33 }
  0x66   :  { %405 = vmatpush.msra.mxu0 %v178_v34  ;;  %424 = vmatpush.msra.mxu1 %v195_v35 }
  0x68   :  { %406 = vmatpush.msra.mxu0 %v177_v37  ;;  %425 = vmatpush.msra.mxu1 %v194_v38 }
  0x6a   :  { %407 = vmatpush.msra.mxu0 %v176_v39  ;;  %426 = vmatpush.msra.mxu1 %v193_v40 }
  0x6b   :  { %408 = vmatmul.f32.vlgmr.msra.gmra.mxu0 %v220_v41 }
  0x6c   :  { %427 = vmatpush.msra.mxu1 %v192_v42 }
  0x6d   :  { %428 = vmatmul.f32.vlgmr.msra.gmra.mxu1 %v221_v43 }
  0xc6   :  { %v249_v45 = vpop.f32.mrf.mxu0 }
  0xc7   :  { %v250_v46 = vadd.f32 %v249_v45, %v209_v44 }
  0xc9   :  { %v269_v47 = vpop.f32.mrf.mxu1  ;;  %v289_v49 = vpop.f32.mrf.mxu2 }
  0xca   :  { %v270_v48 = vadd.f32 %v269_v47, %v250_v46 }
  0xcb   :  { %v309_v51 = vpop.f32.mrf.mxu3 }
  0xcc   :  { %v290_v50 = vadd.f32 %v289_v49, %v270_v48 }
  0xce   :  { %v310_v52 = vadd.f32 %v309_v51, %v290_v50 }
  0xd0   :  { %v329_v53 = vpop.f32.mrf.mxu0 }
  0xd1   :  { %v330_v54 = vadd.f32 %v329_v53, %v310_v52 }
  0xd2   :  { %v349_v55 = vpop.f32.mrf.mxu1 }
  0xd3   :  { %v350_v56 = vadd.f32 %v349_v55, %v330_v54 }
  0xd4   :  { %v369_v57 = vpop.f32.mrf.mxu2 }
  0xd5   :  { %v370_v58 = vadd.f32 %v369_v57, %v350_v56 }
  0xd6   :  { %v389_v59 = vpop.f32.mrf.mxu3 }
  0xd7   :  { %v390_v60 = vadd.f32 %v389_v59, %v370_v58 }
  0xe8   :  { %v409_v61 = vpop.f32.mrf.mxu0 }
  0xe9   :  { %v410_v62 = vadd.f32 %v409_v61, %v390_v60 }
  0xea   :  { %v429_v63 = vpop.f32.mrf.mxu1 }
  0xeb   :  { %v430_v0 = vadd.f32 %v429_v63, %v410_v62 }
  0xed   :  { %432 = vst [vmem:[#allocation8] sm:$0x1] %v430_v0 }
  0xee   :  { %443 = dma.vmem_to_hbm [thread:$0]  %s439_s25, 16, %s441_s27, [#allocation5]  }
  0xef   :  { %532 = dma.done.wait [#allocation5], 16  }
  0xf0   :  { %533 = vsyncadd [#allocation5], 4294967280 }
  0xf1   :  { %448 = vsyncpa [#allocation4], 1 }
  0xf2   :  { %449 = vsyncpa [#allocation7], 1 }
  0xf3   :  { %450 = vsyncpa [#allocation5], 1 }

</bundles_post_ra>
